<compile_context>
chip_gen: v7x
topology: tpu7x:2x2x1
jax: 0.10.0
libtpu: 0.0.40
codegen_flags: <defaults>
</compile_context>

<pallas_src>
import jax
import jax.numpy as jnp
from jax import lax
from jax.experimental import pallas as pl
from jax.experimental.pallas import tpu as pltpu

EPS = 1e-5  # F.layer_norm default


def _sublane_multiple(dtype) -> int:
    # minimum sublane packing: 8 rows for 32-bit, 16 for 16-bit, 32 for 8-bit
    return max(8, 32 // jnp.dtype(dtype).itemsize)


def _vmem_limit_bytes() -> int:
    cap = 0
    try:
        cap = int(pltpu.get_tpu_info().vmem_capacity_bytes)
    except Exception:
        cap = 0
    if cap <= 0:
        kind = ""
        try:
            kind = str(jax.devices()[0].device_kind).lower()
        except Exception:
            pass
        # v7x has 64 MiB per TC; v5e/v6e have 128 MiB.
        cap = (64 if "v7" in kind else 128) * 1024 * 1024
    # scoped limit with headroom for compiler scratch / constants / vregs:
    #   128 MiB parts -> 96 MiB ; 64 MiB part (v7x) -> 40 MiB
    return max(16 * 1024 * 1024, min(cap * 3 // 4, cap - 24 * 1024 * 1024))


def _pick_block_rows(rows: int, row_width: int, dtype, vmem_budget: int,
                     k: int) -> int:
    """Largest row tile (multiple of the sublane packing) that
    (a) fits the VMEM budget, (b) targets ~4 MiB of input per tile to
    amortize per-grid-step overhead, (c) keeps the grid >= ~8 steps so the
    pipeline overlaps and both v7x TensorCores get work."""
    sub = _sublane_multiple(dtype)
    if rows <= sub:
        return rows  # full-extent block (bypasses the (8,128) rule)
    itemsize = jnp.dtype(dtype).itemsize
    # per tile-row VMEM: double-buffered in + out tiles (source dtype)
    # plus ~2-3 f32-wide live temporaries for the in-register compute
    f32_live = 3 if k > 1 else 2
    bytes_per_row = row_width * (4 * itemsize + 4 * f32_live)
    vmem_rows = max(sub, vmem_budget // bytes_per_row)

    tile_input_bytes = 4 * 1024 * 1024            # ~4 MiB input per tile
    target_rows = max(sub, tile_input_bytes // (row_width * itemsize))

    min_grid_steps = 8                             # pipelining + megacore
    steps_rows = -(-rows // min_grid_steps)

    target = min(vmem_rows, target_rows, steps_rows)
    target = max(sub, (target // sub) * sub)
    cap = (rows // sub) * sub  # block <= rows; ragged tail masked by Pallas
    return max(sub, min(target, cap))


def _make_kernel(d: int, k: int, with_beta: bool):
    """LayerNorm kernel for tiles of shape (block_rows, k * d).

    Each 128-lane tile row holds k logical rows of length d (k == 1 for the
    plain layout).  For k > 1 the per-segment mean/var are computed with a
    single MXU contraction per statistic against a block-diagonal ones
    matrix (exact at Precision.HIGHEST); I/O stays lane-dense and the
    VALU/XLU stay free for the memory-bound elementwise work.
    """
    inv_d = 1.0 / float(d)

    def kernel(*refs):
        idx = 0
        x_ref = refs[idx]; idx += 1
        g_ref = refs[idx]; idx += 1
        b_ref = None
        if with_beta:
            b_ref = refs[idx]; idx += 1
        seg_ref = None
        if k > 1:
            seg_ref = refs[idx]; idx += 1
        o_ref = refs[idx]

        x = x_ref[...].astype(jnp.float32)

        if k == 1:
            mean = jnp.sum(x, axis=-1, keepdims=True) * inv_d
            c = x - mean                                   # two-pass variance
            var = jnp.sum(c * c, axis=-1, keepdims=True) * inv_d
            inv = lax.rsqrt(var + EPS)                     # (rows, 1) bcast
        else:
            seg = seg_ref[...]                             # (kd, kd) 0/1 f32
            mean = jnp.dot(x, seg, preferred_element_type=jnp.float32,
                           precision=lax.Precision.HIGHEST) * inv_d
            c = x - mean                                   # two-pass variance
            var = jnp.dot(c * c, seg, preferred_element_type=jnp.float32,
                          precision=lax.Precision.HIGHEST) * inv_d
            inv = lax.rsqrt(var + EPS)                     # per-lane bcast

        y = c * inv * g_ref[...].astype(jnp.float32)
        if with_beta:
            y = y + b_ref[...].astype(jnp.float32)
        o_ref[...] = y.astype(o_ref.dtype)

    return kernel


def layer_norm(x, gamma, beta=None, *, block_rows=None):
    """LayerNorm over the last dim of x (any leading shape).

    beta=None corresponds to the module's registered zero 'beta' buffer: the
    add and its DMA-resident buffer are folded away.  Pass a real beta array
    if the buffer is ever nonzero.
    """
    orig_shape = x.shape
    d = orig_shape[-1]
    x2 = x.reshape(-1, d)
    n = x2.shape[0]
    if n == 0:
        return x

    # Lane-dense repack for small normalized dims: put k = 128 // d logical
    # rows side by side on the 128-lane axis so loads/stores are unmasked.
    # (If n % k != 0 or 128 % d != 0 we fall back to the plain layout; for
    #  d that is not a multiple of 128 the stores are lane-masked.)
    if d < 128 and 128 % d == 0 and n % (128 // d) == 0:
        k = 128 // d
    else:
        k = 1
    rows = n // k
    row_width = k * d

    xp = x2.reshape(rows, row_width)
    g2 = jnp.tile(gamma.reshape(1, d), (1, k))

    vmem_limit = _vmem_limit_bytes()
    if block_rows is None:
        block_rows = _pick_block_rows(rows, row_width, x.dtype,
                                      int(0.8 * vmem_limit), k)

    x_spec = pl.BlockSpec((block_rows, row_width), lambda i: (i, 0))
    p_spec = pl.BlockSpec((1, row_width), lambda i: (0, 0))

    operands = [xp, g2]
    in_specs = [x_spec, p_spec]
    if beta is not None:
        operands.append(jnp.tile(beta.reshape(1, d), (1, k)))
        in_specs.append(p_spec)
    if k > 1:
        lane = jnp.arange(row_width, dtype=jnp.int32) // d
        seg_ones = (lane[:, None] == lane[None, :]).astype(jnp.float32)
        operands.append(seg_ones)
        in_specs.append(
            pl.BlockSpec((row_width, row_width), lambda i: (0, 0)))

    out = pl.pallas_call(
        _make_kernel(d, k, beta is not None),
        out_shape=jax.ShapeDtypeStruct((rows, row_width), x.dtype),
        grid_spec=pltpu.PrefetchScalarGridSpec(
            num_scalar_prefetch=0,
            grid=(pl.cdiv(rows, block_rows),),
            in_specs=in_specs,
            out_specs=x_spec,
        ),
        compiler_params=pltpu.CompilerParams(
            dimension_semantics=("parallel",),
            vmem_limit_bytes=vmem_limit,
        ),
    )(*operands)

    return out.reshape(orig_shape)


def _reference_layer_norm(x, gamma, beta=None):
    xf = x.astype(jnp.float32)
    mean = jnp.mean(xf, axis=-1, keepdims=True)
    var = jnp.mean((xf - mean) ** 2, axis=-1, keepdims=True)
    y = (xf - mean) * lax.rsqrt(var + EPS) * gamma.astype(jnp.float32)
    if beta is not None:
        y = y + beta.astype(jnp.float32)
    return y.astype(x.dtype)


if __name__ == "__main__":
    key = jax.random.PRNGKey(0)
    batch, seq, dim = 2, 8, 32

    x = jax.random.normal(key, (batch, seq, dim), dtype=jnp.float32)
    # nn.Parameter(torch.ones(dim)); the zero 'beta' buffer is folded away.
    gamma = jnp.ones((dim,), dtype=jnp.float32)

    y = jax.block_until_ready(layer_norm(x, gamma))
    y_ref = _reference_layer_norm(x, gamma)
    assert y.shape == x.shape
    assert jnp.allclose(y, y_ref, atol=3e-5, rtol=3e-5)

    # Lane-aligned D (general k=1 path), ragged row count (masked last
    # block), non-trivial gamma/beta.
    x2 = jax.random.normal(jax.random.PRNGKey(1), (5, 3, 128), jnp.float32) * 3.0 + 1.5
    g2 = jax.random.normal(jax.random.PRNGKey(2), (128,), jnp.float32)
    b2 = jax.random.normal(jax.random.PRNGKey(3), (128,), jnp.float32)
    y2 = jax.block_until_ready(layer_norm(x2, g2, b2))
    y2_ref = _reference_layer_norm(x2, g2, b2)
    assert jnp.allclose(y2, y2_ref, atol=1e-4, rtol=1e-4)

    # bf16 input, packed k=2 path (MXU segment reduction), shifted mean
    # (exercises the two-pass variance), with beta.
    x3 = (jax.random.normal(jax.random.PRNGKey(4), (4, 64, 64), jnp.float32)
          * 0.5 + 4.0).astype(jnp.bfloat16)
    g3 = jax.random.normal(jax.random.PRNGKey(5), (64,), jnp.float32).astype(jnp.bfloat16)
    b3 = jax.random.normal(jax.random.PRNGKey(6), (64,), jnp.float32).astype(jnp.bfloat16)
    y3 = jax.block_until_ready(layer_norm(x3, g3, b3))
    y3_ref = _reference_layer_norm(x3, g3, b3)
    assert jnp.allclose(y3.astype(jnp.float32), y3_ref.astype(jnp.float32),
                        atol=1e-1, rtol=5e-2)

    print("KERNEL_OK")
</pallas_src>

<mosaic_0001>
module attributes {stable_mosaic.version = 11 : i64} {
  func.func @kernel(%arg0: i32, %arg1: memref<4x128xf32, #tpu.memory_space<vmem>>, %arg2: memref<1x128xf32, #tpu.memory_space<vmem>>, %arg3: memref<128x128xf32, #tpu.memory_space<vmem>>, %arg4: memref<4x128xf32, #tpu.memory_space<vmem>>) attributes {dimension_semantics = [#tpu.dimension_semantics<parallel>], iteration_bounds = array<i64: 1>, scalar_prefetch = 0 : i64, scratch_operands = 0 : i64, tpu.core_type = #tpu.core_type<tc>, window_params = [{transform_indices = @transform_0, window_bounds = array<i64: 4, 128>}, {pipeline_mode = #tpu.pipeline_mode<synchronous>, transform_indices = @transform_1, window_bounds = array<i64: 1, 128>}, {pipeline_mode = #tpu.pipeline_mode<synchronous>, transform_indices = @transform_2, window_bounds = array<i64: 128, 128>}, {transform_indices = @transform_3, window_bounds = array<i64: 4, 128>}]} {
    %c0 = arith.constant 0 : index
    %c0_0 = arith.constant 0 : index
    %0 = vector.load %arg1[%c0, %c0_0] : memref<4x128xf32, #tpu.memory_space<vmem>>, vector<4x128xf32>
    %c0_1 = arith.constant 0 : index
    %c0_2 = arith.constant 0 : index
    %1 = vector.load %arg3[%c0_1, %c0_2] : memref<128x128xf32, #tpu.memory_space<vmem>>, vector<128x128xf32>
    %cst = arith.constant dense<0.000000e+00> : vector<4x128xf32>
    %2 = tpu.matmul %0, %1, %cst {dimension_numbers = #tpu.dot_dimension_numbers<[1], [0], [0], [1], [0, 0, 1, 1], [], []>, precision = #tpu.contract_precision<fp32>} : vector<4x128xf32>, vector<128x128xf32>, vector<4x128xf32> -> vector<4x128xf32>
    %cst_3 = arith.constant 3.125000e-02 : f32
    %3 = vector.broadcast %cst_3 : f32 to vector<4x128xf32>
    %4 = arith.mulf %2, %3 : vector<4x128xf32>
    %5 = arith.subf %0, %4 : vector<4x128xf32>
    %6 = arith.mulf %5, %5 : vector<4x128xf32>
    %cst_4 = arith.constant dense<0.000000e+00> : vector<4x128xf32>
    %7 = tpu.matmul %6, %1, %cst_4 {dimension_numbers = #tpu.dot_dimension_numbers<[1], [0], [0], [1], [0, 0, 1, 1], [], []>, precision = #tpu.contract_precision<fp32>} : vector<4x128xf32>, vector<128x128xf32>, vector<4x128xf32> -> vector<4x128xf32>
    %cst_5 = arith.constant 3.125000e-02 : f32
    %8 = vector.broadcast %cst_5 : f32 to vector<4x128xf32>
    %9 = arith.mulf %7, %8 : vector<4x128xf32>
    %cst_6 = arith.constant 9.99999974E-6 : f32
    %10 = vector.broadcast %cst_6 : f32 to vector<4x128xf32>
    %11 = arith.addf %9, %10 : vector<4x128xf32>
    %12 = math.rsqrt %11 : vector<4x128xf32>
    %13 = arith.mulf %5, %12 : vector<4x128xf32>
    %c0_7 = arith.constant 0 : index
    %c0_8 = arith.constant 0 : index
    %14 = vector.load %arg2[%c0_7, %c0_8] : memref<1x128xf32, #tpu.memory_space<vmem>>, vector<1x128xf32>
    %15 = vector.broadcast %14 : vector<1x128xf32> to vector<4x128xf32>
    %16 = arith.mulf %13, %15 : vector<4x128xf32>
    %c0_9 = arith.constant 0 : index
    %c0_10 = arith.constant 0 : index
    %17 = vector.load %arg4[%c0_9, %c0_10] : memref<4x128xf32, #tpu.memory_space<vmem>>, vector<4x128xf32>
    tpu.vector_store %arg4[%c0_9, %c0_10], %16 {strides = array<i32>} : memref<4x128xf32, #tpu.memory_space<vmem>>, vector<4x128xf32>,
    return
  }
  func.func @transform_0(%arg0: i32) -> (i32, i32) {
    %c0_i32 = arith.constant 0 : i32
    %c0_i32_0 = arith.constant 0 : i32
    return %arg0, %c0_i32 : i32, i32
  }
  func.func @transform_1(%arg0: i32) -> (i32, i32) {
    %c0_i32 = arith.constant 0 : i32
    %c0_i32_0 = arith.constant 0 : i32
    %c0_i32_1 = arith.constant 0 : i32
    return %c0_i32, %c0_i32_0 : i32, i32
  }
  func.func @transform_2(%arg0: i32) -> (i32, i32) {
    %c0_i32 = arith.constant 0 : i32
    %c0_i32_0 = arith.constant 0 : i32
    %c0_i32_1 = arith.constant 0 : i32
    return %c0_i32, %c0_i32_0 : i32, i32
  }
  func.func @transform_3(%arg0: i32) -> (i32, i32) {
    %c0_i32 = arith.constant 0 : i32
    %c0_i32_0 = arith.constant 0 : i32
    return %arg0, %c0_i32 : i32, i32
  }
}

</mosaic_0001>

<bundles_post_ra>
// kernel: tpu_custom_call.1
= control target key start
LH: loop header
LB: loop body
LE: loop exit
PB: predicated region body
PF: predicated region fallthrough
CT: control target
= control target key end

     0   :  { %8 = vsyncpa [#allocation3], 0  ;;  %s2889_s0 = inlined_call_operand.hbm [shape: f32[4,128], index: 0, kind: input, shape index: {}]   ;;  %s2890_s1 = inlined_call_operand.hbm [shape: f32[1,128], index: 1, kind: input, shape index: {}]   ;;  %s2891_s2 = inlined_call_operand.hbm [shape: f32[128,128], index: 2, kind: input, shape index: {}]   ;;  %s2892_s3 = inlined_call_operand.hbm [shape: f32[4,128], index: 3, kind: output, shape index: {}]  }
   0x1   :  { %9 = vsyncpa [#allocation6], 0 }
   0x2   :  { %10 = vsyncpa [#allocation4], 0  ;;  %s2421_s12 = smov [#allocation5]   ;;  %s2422_s14 = smov [#allocation2]  }
   0x3   :  { %s27_s13 = sshll.u32 %s2421_s12, 4  ;;  %s17_s15 = sshll.u32 %s2422_s14, 4  ;;  %s28_s13 = int_to_ptr.vmem [resolvable:$true] %s27_s13  ;;  %s18_s15 = int_to_ptr.vmem [resolvable:$true] %s17_s15 }
   0x4   :  { %s2327_s18 = scalar_lea.hbm %s2890_s1, 16 }
   0x5   :  { %p2328_p0 = scmp.ne.s32.totalorder %s2890_s1, %s2327_s18  ;;  %p2331_p1 = scmp.lt.u32.totalorder %s2327_s18, %s2890_s1 }
   0x7   :  { %p2333_p2 = pnand %p2331_p1, %p2328_p0 }
   0x9   :  { %2336 = shalt.err (!%p2333_p2)
}
   0xa   :  { %s2337_s23 = scalar_lea.vmem %s28_s13, 16  ;;  %s2341_s24 = scalar_lea.vmem %s28_s13, 32 }
   0xb   :  { %p2338_p3 = scmp.ne.s32.totalorder %s28_s13, %s2337_s23  ;;  %p2342_p4 = scmp.lt.s32.totalorder %s28_s13, %s28_s13 }
   0xc   :  { %p2343_p5 = scmp.lt.s32.totalorder %s2341_s24, %s2337_s23 }
   0xe   :  { %p2344_p6 = por %p2343_p5, %p2342_p4 }
  0x10   :  { %p2345_p7 = pnand %p2344_p6, %p2338_p3 }
  0x12   :  { %2348 = shalt.err (!%p2345_p7)
}
  0x13   :  { %30 = dma.hbm_to_vmem [thread:$0]  %s2890_s1, 16, %s28_s13, [#allocation6]  }
  0x14   :  { %s2349_s29 = scalar_lea.hbm %s2889_s0, 64 }
  0x15   :  { %p2350_p8 = scmp.ne.s32.totalorder %s2889_s0, %s2349_s29  ;;  %p2353_p9 = scmp.lt.u32.totalorder %s2349_s29, %s2889_s0 }
  0x17   :  { %p2355_p10 = pnand %p2353_p9, %p2350_p8 }
  0x19   :  { %2358 = shalt.err (!%p2355_p10)
}
  0x1a   :  { %s2359_s7 = scalar_lea.vmem %s18_s15, 64  ;;  %p2364_p12 = scmp.lt.s32.totalorder %s18_s15, %s18_s15 }
  0x1b   :  { %p2360_p11 = scmp.ne.s32.totalorder %s18_s15, %s2359_s7  ;;  %p2365_p13 = scmp.lt.s32.totalorder %s2359_s7, %s2359_s7 }
  0x1d   :  { %p2366_p0 = por %p2365_p13, %p2364_p12 }
  0x1f   :  { %p2367_p1 = pnand %p2366_p0, %p2360_p11 }
  0x21   :  { %2370 = shalt.err (!%p2367_p1)
}
  0x22   :  { %20 = dma.hbm_to_vmem [thread:$0]  %s2889_s0, 64, %s18_s15, [#allocation3]  }
  0x23   :  { %s2423_s9 = smov [#allocation7]   ;;  %s2371_s13 = scalar_lea.hbm %s2891_s2, 2048 }
  0x24   :  { %s36_s10 = sshll.u32 %s2423_s9, 4  ;;  %p2372_p2 = scmp.ne.s32.totalorder %s2891_s2, %s2371_s13  ;;  %s37_s10 = int_to_ptr.vmem [resolvable:$true] %s36_s10 }
  0x25   :  { %p2375_p3 = scmp.lt.u32.totalorder %s2371_s13, %s2891_s2 }
  0x27   :  { %p2377_p4 = pnand %p2375_p3, %p2372_p2 }
  0x29   :  { %2380 = shalt.err (!%p2377_p4)
}
  0x2a   :  { %s2381_s19 = scalar_lea.vmem %s37_s10, 2048  ;;  %p2386_p6 = scmp.lt.s32.totalorder %s37_s10, %s37_s10 }
  0x2b   :  { %p2382_p5 = scmp.ne.s32.totalorder %s37_s10, %s2381_s19  ;;  %p2387_p7 = scmp.lt.s32.totalorder %s2381_s19, %s2381_s19 }
  0x2d   :  { %p2388_p8 = por %p2387_p7, %p2386_p6 }
  0x2f   :  { %p2389_p9 = pnand %p2388_p8, %p2382_p5 }
  0x31   :  { %2392 = shalt.err (!%p2389_p9)
}
  0x32   :  { %s2424_s0 = smov 128   ;;  %s2425_s15 = smov 8  }
  0x33   :  { %42 = dma.hbm_to_vmem [thread:$0]  %s2891_s2, 2048, %s37_s10, [#allocation6], %s2424_s0, %s2424_s0, %s2425_s15  }
  0x34   :  { %2415 = dma.done.wait [#allocation3], 64  }
  0x35   :  { %2416 = vsyncadd [#allocation3], 4294967232 }
  0x36   :  { %2417 = dma.done.wait [#allocation6], 2064  }
  0x37   :  { %2418 = vsyncadd [#allocation6], 4294965232  ;;  %v2426_v0 = vmov 0.0|0.0   ;;  %vm2427_vm0 = vmmov 0   ;;  %v2428_v1 = vmov 0.0   ;;  %v53_v2 = vld [vmem:[#allocation7] sm:$0xff] }
  0x38   :  { %2008 = vmatprep.subr.bf16.mxu0 %v2426_v0  ;;  %1620 = vmatprep.mubr.msk.f32.mxu0 %vm2427_vm0, %v2428_v1  ;;  %v54_v3 = vld [vmem:[#allocation7 + $0x8] sm:$0xff]  ;;  %v55_v4 = vld [vmem:[#allocation7 + $0x10] sm:$0xff]  ;;  %v70_v5 = vand.u32 4294901760, %v53_v2  ;;  %v56_v7 = vld [vmem:[#allocation7 + $0x18] sm:$0xff]  ;;  %s2429_s2 = smov [#allocation8]  }
  0x39   :  { %2152 = vmatprep.subr.bf16.mxu1 %v2426_v0  ;;  %1830 = vmatprep.mubr.msk.f32.mxu1 %vm2427_vm0, %v2428_v1  ;;  %v73_v6 = vand.u32 4294901760, %v54_v3  ;;  %v76_v8 = vand.u32 4294901760, %v55_v4  ;;  %v79_v9 = vand.u32 4294901760, %v56_v7  ;;  %v57_v10 = vld [vmem:[#allocation7 + $0x20] sm:$0xff]  ;;  %v58_v11 = vld [vmem:[#allocation7 + $0x28] sm:$0xff]  ;;  %v59_v16 = vld [vmem:[#allocation7 + $0x30] sm:$0xff] }
  0x3a   :  { %v82_v14 = vand.u32 4294901760, %v57_v10  ;;  %v85_v15 = vand.u32 4294901760, %v58_v11  ;;  %v60_v17 = vld [vmem:[#allocation7 + $0x38] sm:$0xff]  ;;  %v88_v19 = vand.u32 4294901760, %v59_v16  ;;  %v61_v21 = vld [vmem:[#allocation7 + $0x40] sm:$0xff]  ;;  %v62_v23 = vld [vmem:[#allocation7 + $0x48] sm:$0xff]  ;;  %v2514_v34 = vsub.f32 %v53_v2, %v70_v5 }
  0x3b   :  { %v2492_v12 = vpack.c.bf16 %v73_v6, %v70_v5  ;;  %v2495_v13 = vpack.c.bf16 %v79_v9, %v76_v8  ;;  %v91_v20 = vand.u32 4294901760, %v60_v17  ;;  %v2503_v22 = vld [vmem:[#allocation2] sm:$0xf]  ;;  %v63_v24 = vld [vmem:[#allocation7 + $0x50] sm:$0xff]  ;;  %v65_v26 = vld [vmem:[#allocation7 + $0x60] sm:$0xff]  ;;  %v94_v27 = vand.u32 4294901760, %v61_v21 }
  0x3c   :  { %v2501_v18 = vpack.c.bf16 %v85_v15, %v82_v14  ;;  %v64_v25 = vld [vmem:[#allocation7 + $0x58] sm:$0xff]  ;;  %v66_v28 = vld [vmem:[#allocation7 + $0x68] sm:$0xff]  ;;  %v67_v29 = vld [vmem:[#allocation7 + $0x70] sm:$0xff]  ;;  %v2509_v31 = vand.u32 4294901760, %v2503_v22  ;;  %v97_v33 = vand.u32 4294901760, %v62_v23  ;;  %v2516_v35 = vsub.f32 %v54_v3, %v73_v6  ;;  %s1373_s22 = sshll.u32 %s2429_s2, 4  ;;  %s1374_s22 = int_to_ptr.vmem [resolvable:$true] %s1373_s22 }
  0x3d   :  { %2010 = vmatpush3.bf16.msra.mxu0 %v2492_v12  ;;  %2154 = vmatpush3.bf16.msra.mxu1 %v2492_v12  ;;  %v68_v30 = vld [vmem:[#allocation7 + $0x78] sm:$0xff]  ;;  %v2512_v32 = vpack.c.bf16 %v91_v20, %v88_v19  ;;  %v100_v36 = vand.u32 4294901760, %v63_v24  ;;  %v103_v37 = vand.u32 4294901760, %v64_v25  ;;  %v106_v38 = vand.u32 4294901760, %v65_v26  ;;  %s2393_s23 = scalar_lea.vmem %s1374_s22, 64  ;;  %p2398_p11 = scmp.lt.s32.totalorder %s1374_s22, %s1374_s22 }
  0x3e   :  { %2011 = vmatprep.subr.bf16.mxu0 %v2426_v0  ;;  %2155 = vmatprep.subr.bf16.mxu1 %v2426_v0  ;;  %v109_v39 = vand.u32 4294901760, %v66_v28  ;;  %v112_v40 = vand.u32 4294901760, %v67_v29  ;;  %v115_v41 = vand.u32 4294901760, %v68_v30  ;;  %v2523_v42 = vsub.f32 %v2503_v22, %v2509_v31  ;;  %p2394_p10 = scmp.ne.s32.totalorder %s1374_s22, %s2393_s23  ;;  %p2399_p12 = scmp.lt.s32.totalorder %s2393_s23, %s2393_s23 }
  0x3f   :  { %v2525_v43 = vsub.f32 %v55_v4, %v76_v8  ;;  %v2528_v44 = vpack.c.bf16 %v97_v33, %v94_v27  ;;  %v163_v45 = vand.u32 4294901760, %v2514_v34  ;;  %v170_v46 = vand.u32 4294901760, %v2516_v35 }
  0x40   :  { %v2532_v47 = vsub.f32 %v56_v7, %v79_v9  ;;  %v2536_v48 = vsub.f32 %v57_v10, %v82_v14  ;;  %v2539_v49 = vpack.c.bf16 %v103_v37, %v100_v36  ;;  %v2541_v50 = vpack.c.bf16 %v109_v39, %v106_v38  ;;  %p2400_p13 = por %p2399_p12, %p2398_p11 }
  0x41   :  { %2013 = vmatpush3.bf16.msra.mxu0 %v2495_v13  ;;  %2157 = vmatpush3.bf16.msra.mxu1 %v2495_v13  ;;  %v2543_v51 = vpack.c.bf16 %v115_v41, %v112_v40  ;;  %v152_v52 = vand.u32 4294901760, %v2523_v42  ;;  %v177_v53 = vand.u32 4294901760, %v2525_v43  ;;  %v2547_v54 = vsub.f32 %v58_v11, %v85_v15 }
  0x42   :  { %2014 = vmatprep.subr.bf16.mxu0 %v2426_v0  ;;  %2158 = vmatprep.subr.bf16.mxu1 %v2426_v0  ;;  %v2549_v55 = vsub.f32 %v59_v16, %v88_v19  ;;  %v164_v56 = vsub.f32 %v2514_v34, %v163_v45  ;;  %v171_v57 = vsub.f32 %v2516_v35, %v170_v46  ;;  %v184_v58 = vand.u32 4294901760, %v2532_v47  ;;  %p2401_p0 = pnand %p2400_p13, %p2394_p10 }
  0x43   :  { %v2555_v59 = vsub.f32 %v60_v17, %v91_v20  ;;  %v191_v60 = vand.u32 4294901760, %v2536_v48  ;;  %v2560_v61 = vsub.f32 %v61_v21, %v94_v27  ;;  %v2562_v62 = vsub.f32 %v62_v23, %v97_v33 }
  0x44   :  { %v2564_v63 = vsub.f32 %v63_v24, %v100_v36  ;;  %v2567_v2 = vsub.f32 %v64_v25, %v103_v37  ;;  %v2569_v3 = vsub.f32 %v65_v26, %v106_v38  ;;  %v2571_v4 = vsub.f32 %v66_v28, %v109_v39 }
  0x45   :  { %2016 = vmatpush3.bf16.msra.mxu0 %v2501_v18  ;;  %2160 = vmatpush3.bf16.msra.mxu1 %v2501_v18  ;;  %v2573_v5 = vsub.f32 %v67_v29, %v112_v40  ;;  %v153_v6 = vsub.f32 %v2523_v42, %v152_v52  ;;  %v178_v7 = vsub.f32 %v2525_v43, %v177_v53  ;;  %v198_v8 = vand.u32 4294901760, %v2547_v54 }
  0x46   :  { %2017 = vmatprep.subr.bf16.mxu0 %v2426_v0  ;;  %2161 = vmatprep.subr.bf16.mxu1 %v2426_v0  ;;  %v2580_v9 = vsub.f32 %v68_v30, %v115_v41  ;;  %v165_v10 = vand.u32 4294901760, %v164_v56  ;;  %v172_v11 = vand.u32 4294901760, %v171_v57  ;;  %v185_v14 = vsub.f32 %v2532_v47, %v184_v58 }
  0x47   :  { %v205_v15 = vand.u32 4294901760, %v2549_v55  ;;  %v212_v16 = vand.u32 4294901760, %v2555_v59  ;;  %v219_v17 = vand.u32 4294901760, %v2560_v61  ;;  %v226_v19 = vand.u32 4294901760, %v2562_v62 }
  0x48   :  { %v233_v20 = vand.u32 4294901760, %v2564_v63  ;;  %v240_v21 = vand.u32 4294901760, %v2567_v2  ;;  %v247_v23 = vand.u32 4294901760, %v2569_v3  ;;  %v254_v24 = vand.u32 4294901760, %v2571_v4 }
  0x49   :  { %2019 = vmatpush3.bf16.msra.mxu0 %v2512_v32  ;;  %2163 = vmatpush3.bf16.msra.mxu1 %v2512_v32  ;;  %v261_v25 = vand.u32 4294901760, %v2573_v5  ;;  %v268_v26 = vand.u32 4294901760, %v2580_v9  ;;  %v2597_v27 = vpack.c.bf16 %v170_v46, %v163_v45  ;;  %v2599_v28 = vpack.c.bf16 %v184_v58, %v177_v53 }
  0x4a   :  { %2020 = vmatprep.subr.bf16.mxu0 %v2426_v0  ;;  %2164 = vmatprep.subr.bf16.mxu1 %v2426_v0  ;;  %v2601_v29 = vpack.c.bf16 %v198_v8, %v191_v60  ;;  %v2604_v30 = vpack.c.bf16 %v212_v16, %v205_v15  ;;  %v2606_v33 = vpack.c.bf16 %v226_v19, %v219_v17  ;;  %v154_v39 = vand.u32 4294901760, %v153_v6 }
  0x4b   :  { %v2608_v36 = vpack.c.bf16 %v240_v21, %v233_v20  ;;  %v2610_v37 = vpack.c.bf16 %v254_v24, %v247_v23  ;;  %v2613_v38 = vpack.c.bf16 %v268_v26, %v261_v25  ;;  %v192_v40 = vsub.f32 %v2536_v48, %v191_v60 }
  0x4c   :  { %v2619_v41 = vpack.c.bf16 %v172_v11, %v165_v10  ;;  %v179_v45 = vand.u32 4294901760, %v178_v7  ;;  %v186_v46 = vand.u32 4294901760, %v185_v14  ;;  %v199_v53 = vsub.f32 %v2547_v54, %v198_v8 }
  0x4d   :  { %2022 = vmatpush3.bf16.msra.mxu0 %v2528_v44  ;;  %2166 = vmatpush3.bf16.msra.mxu1 %v2528_v44  ;;  %v206_v56 = vsub.f32 %v2549_v55, %v205_v15  ;;  %v193_v58 = vand.u32 4294901760, %v192_v40  ;;  %v213_v6 = vsub.f32 %v2555_v59, %v212_v16  ;;  %v220_v11 = vsub.f32 %v2560_v61, %v219_v17 }
  0x4e   :  { %2023 = vmatprep.subr.bf16.mxu0 %v2426_v0  ;;  %2167 = vmatprep.subr.bf16.mxu1 %v2426_v0  ;;  %v2627_v57 = vpack.c.bf16 %v186_v46, %v179_v45  ;;  %v200_v60 = vand.u32 4294901760, %v199_v53  ;;  %v227_v14 = vsub.f32 %v2562_v62, %v226_v19  ;;  %v234_v15 = vsub.f32 %v2564_v63, %v233_v20 }
  0x4f   :  { %v207_v7 = vand.u32 4294901760, %v206_v56  ;;  %v214_v10 = vand.u32 4294901760, %v213_v6  ;;  %v241_v45 = vsub.f32 %v2567_v2, %v240_v21  ;;  %v248_v46 = vsub.f32 %v2569_v3, %v247_v23 }
  0x50   :  { %v2634_v8 = vpack.c.bf16 %v200_v60, %v193_v58  ;;  %v228_v40 = vand.u32 4294901760, %v227_v14  ;;  %v235_v19 = vand.u32 4294901760, %v234_v15  ;;  %v255_v20 = vsub.f32 %v2571_v4, %v254_v24 }
  0x51   :  { %2025 = vmatpush3.bf16.msra.mxu0 %v2539_v49  ;;  %2169 = vmatpush3.bf16.msra.mxu1 %v2539_v49  ;;  %v2641_v16 = vpack.c.bf16 %v214_v10, %v207_v7  ;;  %v242_v53 = vand.u32 4294901760, %v241_v45  ;;  %v262_v56 = vsub.f32 %v2573_v5, %v261_v25  ;;  %v249_v21 = vand.u32 4294901760, %v248_v46 }
  0x52   :  { %2026 = vmatprep.subr.bf16.mxu0 %v2426_v0  ;;  %2170 = vmatprep.subr.bf16.mxu1 %v2426_v0  ;;  %v256_v60 = vand.u32 4294901760, %v255_v20  ;;  %v269_v23 = vsub.f32 %v2580_v9, %v268_v26  ;;  %v2668_v26 = vpack.c.bf16 %v2516_v35, %v2514_v34  ;;  %v2675_v10 = vpack.c.bf16 %v2532_v47, %v2525_v43 }
  0x53   :  { %v2653_v58 = vpack.c.bf16 %v242_v53, %v235_v19  ;;  %v263_v7 = vand.u32 4294901760, %v262_v56  ;;  %v2683_v34 = vpack.c.bf16 %v2547_v54, %v2536_v48  ;;  %v2689_v35 = vpack.c.bf16 %v2555_v59, %v2549_v55 }
  0x54   :  { %v2658_v6 = vpack.c.bf16 %v256_v60, %v249_v21  ;;  %v270_v24 = vand.u32 4294901760, %v269_v23  ;;  %v2695_v43 = vpack.c.bf16 %v2562_v62, %v2560_v61  ;;  %v2701_v47 = vpack.c.bf16 %v2567_v2, %v2564_v63 }
  0x55   :  { %2028 = vmatpush3.bf16.msra.mxu0 %v2541_v50  ;;  %2172 = vmatpush3.bf16.msra.mxu1 %v2541_v50  ;;  %v2707_v48 = vpack.c.bf16 %v2571_v4, %v2569_v3  ;;  %v2713_v54 = vpack.c.bf16 %v2580_v9, %v2573_v5 }
  0x56   :  { %2029 = vmatprep.subr.bf16.mxu0 %v2426_v0  ;;  %2173 = vmatprep.subr.bf16.mxu1 %v2426_v0  ;;  %v2662_v25 = vpack.c.bf16 %v270_v24, %v263_v7 }
  0x59   :  { %2031 = vmatpush3.bf16.msra.mxu0 %v2543_v51  ;;  %2175 = vmatpush3.bf16.msra.mxu1 %v2543_v51 }
  0x5a   :  { %2032 = vmatprep.subr.bf16.mxu0 %v2426_v0  ;;  %2176 = vmatprep.subr.bf16.mxu1 %v2426_v0 }
  0x5c   :  { %1621 = vmatmul.mubr.f32.vlgmr.msra.gmra.mrb[0].mxu0 %v154_v39  ;;  %v221_v39 = vand.u32 4294901760, %v220_v11 }
  0x5d   :  { %2034 = vmatpush3.bf16.msra.mxu0 %v2619_v41  ;;  %1655 = vmatprep.mubr.msk.f32.mxu0 %vm2427_vm0, %v2428_v1 }
  0x5e   :  { %2035 = vmatprep.subr.bf16.mxu0 %v2426_v0  ;;  %v2647_v17 = vpack.c.bf16 %v228_v40, %v221_v39 }
  0x61   :  { %2037 = vmatpush3.bf16.msra.mxu0 %v2627_v57 }
  0x62   :  { %2038 = vmatprep.subr.bf16.mxu0 %v2426_v0 }
  0x65   :  { %2040 = vmatpush3.bf16.msra.mxu0 %v2634_v8 }
  0x66   :  { %2041 = vmatprep.subr.bf16.mxu0 %v2426_v0 }
  0x69   :  { %2043 = vmatpush3.bf16.msra.mxu0 %v2641_v16 }
  0x6a   :  { %2044 = vmatprep.subr.bf16.mxu0 %v2426_v0 }
  0x6d   :  { %2046 = vmatpush3.bf16.msra.mxu0 %v2647_v17 }
  0x6e   :  { %2047 = vmatprep.subr.bf16.mxu0 %v2426_v0 }
  0x71   :  { %2049 = vmatpush3.bf16.msra.mxu0 %v2653_v58 }
  0x72   :  { %2050 = vmatprep.subr.bf16.mxu0 %v2426_v0 }
  0x75   :  { %2052 = vmatpush3.bf16.msra.mxu0 %v2658_v6 }
  0x76   :  { %2053 = vmatprep.subr.bf16.mxu0 %v2426_v0 }
  0x79   :  { %2055 = vmatpush3.bf16.msra.mxu0 %v2662_v25 }
  0x7a   :  { %2056 = vmatprep.subr.bf16.mxu0 %v2426_v0 }
  0x7c   :  { %1656 = vmatmul.mubr.f32.vlgmr.msra.gmra.mrb[0].mxu0 %v2509_v31 }
  0x7d   :  { %2058 = vmatpush3.bf16.msra.mxu0 %v2668_v26  ;;  %1690 = vmatprep.mubr.msk.f32.mxu0 %vm2427_vm0, %v2428_v1 }
  0x7e   :  { %2059 = vmatprep.subr.bf16.mxu0 %v2426_v0 }
  0x81   :  { %2061 = vmatpush3.bf16.msra.mxu0 %v2675_v10 }
  0x82   :  { %2062 = vmatprep.subr.bf16.mxu0 %v2426_v0 }
  0x85   :  { %2064 = vmatpush3.bf16.msra.mxu0 %v2683_v34 }
  0x86   :  { %2065 = vmatprep.subr.bf16.mxu0 %v2426_v0 }
  0x89   :  { %2067 = vmatpush3.bf16.msra.mxu0 %v2689_v35 }
  0x8a   :  { %2068 = vmatprep.subr.bf16.mxu0 %v2426_v0 }
  0x8d   :  { %2070 = vmatpush3.bf16.msra.mxu0 %v2695_v43 }
  0x8e   :  { %2071 = vmatprep.subr.bf16.mxu0 %v2426_v0 }
  0x91   :  { %2073 = vmatpush3.bf16.msra.mxu0 %v2701_v47 }
  0x92   :  { %2074 = vmatprep.subr.bf16.mxu0 %v2426_v0 }
  0x95   :  { %2076 = vmatpush3.bf16.msra.mxu0 %v2707_v48 }
  0x96   :  { %2077 = vmatprep.subr.bf16.mxu0 %v2426_v0 }
  0x99   :  { %2079 = vmatpush3.bf16.msra.mxu0 %v2713_v54 }
  0x9a   :  { %2080 = vmatprep.subr.bf16.mxu0 %v2426_v0 }
  0x9c   :  { %1691 = vmatmul.mubr.f32.vlgmr.msra.gmra.mrb[0].mxu0 %v2523_v42 }
  0x9d   :  { %2082 = vmatpush3.bf16.msra.mxu0 %v2492_v12  ;;  %1725 = vmatprep.mubr.msk.f32.mxu0 %vm2427_vm0, %v2428_v1 }
  0x9e   :  { %2083 = vmatprep.subr.bf16.mxu0 %v2426_v0 }
  0xa1   :  { %2085 = vmatpush3.bf16.msra.mxu0 %v2495_v13 }
  0xa2   :  { %2086 = vmatprep.subr.bf16.mxu0 %v2426_v0 }
  0xa5   :  { %2088 = vmatpush3.bf16.msra.mxu0 %v2501_v18 }
  0xa6   :  { %2089 = vmatprep.subr.bf16.mxu0 %v2426_v0 }
  0xa9   :  { %2091 = vmatpush3.bf16.msra.mxu0 %v2512_v32 }
  0xaa   :  { %2092 = vmatprep.subr.bf16.mxu0 %v2426_v0 }
  0xad   :  { %2094 = vmatpush3.bf16.msra.mxu0 %v2528_v44 }
  0xae   :  { %2095 = vmatprep.subr.bf16.mxu0 %v2426_v0 }
  0xb1   :  { %2097 = vmatpush3.bf16.msra.mxu0 %v2539_v49 }
  0xb2   :  { %2098 = vmatprep.subr.bf16.mxu0 %v2426_v0 }
  0xb5   :  { %2100 = vmatpush3.bf16.msra.mxu0 %v2541_v50 }
  0xb6   :  { %2101 = vmatprep.subr.bf16.mxu0 %v2426_v0 }
  0xb9   :  { %2103 = vmatpush3.bf16.msra.mxu0 %v2543_v51 }
  0xba   :  { %2104 = vmatprep.subr.bf16.mxu0 %v2426_v0 }
  0xbc   :  { %1726 = vmatmul.mubr.f32.vlgmr.msra.gmra.mrb[0].mxu0 %v152_v52 }
  0xbd   :  { %2106 = vmatpush3.bf16.msra.mxu0 %v2597_v27  ;;  %1760 = vmatprep.mubr.msk.f32.mxu0 %vm2427_vm0, %v2428_v1 }
  0xbe   :  { %2107 = vmatprep.subr.bf16.mxu0 %v2426_v0 }
  0xc1   :  { %2109 = vmatpush3.bf16.msra.mxu0 %v2599_v28 }
  0xc2   :  { %2110 = vmatprep.subr.bf16.mxu0 %v2426_v0 }
  0xc5   :  { %2112 = vmatpush3.bf16.msra.mxu0 %v2601_v29 }
  0xc6   :  { %2113 = vmatprep.subr.bf16.mxu0 %v2426_v0 }
  0xc9   :  { %2115 = vmatpush3.bf16.msra.mxu0 %v2604_v30 }
  0xca   :  { %2116 = vmatprep.subr.bf16.mxu0 %v2426_v0 }
  0xcd   :  { %2118 = vmatpush3.bf16.msra.mxu0 %v2606_v33 }
  0xce   :  { %2119 = vmatprep.subr.bf16.mxu0 %v2426_v0 }
  0xd1   :  { %2121 = vmatpush3.bf16.msra.mxu0 %v2608_v36 }
  0xd2   :  { %2122 = vmatprep.subr.bf16.mxu0 %v2426_v0 }
  0xd5   :  { %2124 = vmatpush3.bf16.msra.mxu0 %v2610_v37 }
  0xd6   :  { %2125 = vmatprep.subr.bf16.mxu0 %v2426_v0 }
  0xd9   :  { %2127 = vmatpush3.bf16.msra.mxu0 %v2613_v38 }
  0xda   :  { %2128 = vmatprep.subr.bf16.mxu0 %v2426_v0 }
  0xdc   :  { %1761 = vmatmul.mubr.f32.vlgmr.msra.gmra.mrb[0].mxu0 %v2509_v31 }
  0xdd   :  { %2130 = vmatpush3.bf16.msra.mxu0 %v2492_v12  ;;  %1795 = vmatprep.mubr.msk.f32.mxu0 %vm2427_vm0, %v2428_v1 }
  0xde   :  { %2131 = vmatprep.subr.bf16.mxu0 %v2426_v0 }
  0xe1   :  { %2133 = vmatpush3.bf16.msra.mxu0 %v2495_v13 }
  0xe2   :  { %2134 = vmatprep.subr.bf16.mxu0 %v2426_v0 }
  0xe5   :  { %2136 = vmatpush3.bf16.msra.mxu0 %v2501_v18 }
  0xe6   :  { %2137 = vmatprep.subr.bf16.mxu0 %v2426_v0 }
  0xe9   :  { %2139 = vmatpush3.bf16.msra.mxu0 %v2512_v32 }
  0xea   :  { %2140 = vmatprep.subr.bf16.mxu0 %v2426_v0 }
  0xed   :  { %2142 = vmatpush3.bf16.msra.mxu0 %v2528_v44 }
  0xee   :  { %2143 = vmatprep.subr.bf16.mxu0 %v2426_v0 }
  0xf1   :  { %2145 = vmatpush3.bf16.msra.mxu0 %v2539_v49 }
  0xf2   :  { %2146 = vmatprep.subr.bf16.mxu0 %v2426_v0 }
  0xf5   :  { %2148 = vmatpush3.bf16.msra.mxu0 %v2541_v50 }
  0xf6   :  { %2149 = vmatprep.subr.bf16.mxu0 %v2426_v0 }
  0xf9   :  { %2151 = vmatpush3.bf16.msra.mxu0 %v2543_v51 }
  0xfc   :  { %1796 = vmatmul.mubr.f32.vlgmr.msra.gmra.mrb[0].mxu0 %v2509_v31  ;;  %v1383_v31 = vld [vmem:[#allocation5] ss:$0 sm:$0xff] }
 0x1cf   :  { %v706_v42 = vpop.f32.mrb[0].mxu0 }
 0x1d0   :  { %v710_v52 = vmul.f32 0.03125, %v706_v42  ;;  %v1797_v55 = vpop.f32.mrb[1].mxu0 }
 0x1d2   :  { %v2777_v59 = vsub.f32 %v2503_v22, %v710_v52 }
 0x1d4   :  { %v712_v61 = vmul.f32 %v2777_v59, %v2777_v59 }
 0x1d6   :  { %v2781_v62 = vand.u32 4294901760, %v712_v61 }
 0x1d8   :  { %v795_v63 = vsub.f32 %v712_v61, %v2781_v62 }
 0x1da   :  { %v796_v2 = vand.u32 4294901760, %v795_v63 }
 0x1dc   :  { %v797_v3 = vsub.f32 %v795_v63, %v796_v2 }
 0x1de   :  { %v798_v4 = vand.u32 4294901760, %v797_v3 }
 0x1e0   :  { %1831 = vmatmul.mubr.f32.vlgmr.msra.gmra.mrb[0].mxu1 %v798_v4 }
 0x1e1   :  { %2178 = vmatpush3.bf16.msra.mxu1 %v2619_v41  ;;  %1865 = vmatprep.mubr.msk.f32.mxu1 %vm2427_vm0, %v2428_v1 }
 0x1e2   :  { %2179 = vmatprep.subr.bf16.mxu1 %v2426_v0 }
 0x1e5   :  { %2181 = vmatpush3.bf16.msra.mxu1 %v2627_v57 }
 0x1e6   :  { %2182 = vmatprep.subr.bf16.mxu1 %v2426_v0 }
 0x1e9   :  { %2184 = vmatpush3.bf16.msra.mxu1 %v2634_v8 }
 0x1ea   :  { %2185 = vmatprep.subr.bf16.mxu1 %v2426_v0 }
 0x1ed   :  { %2187 = vmatpush3.bf16.msra.mxu1 %v2641_v16 }
 0x1ee   :  { %2188 = vmatprep.subr.bf16.mxu1 %v2426_v0 }
 0x1f1   :  { %2190 = vmatpush3.bf16.msra.mxu1 %v2647_v17 }
 0x1f2   :  { %2191 = vmatprep.subr.bf16.mxu1 %v2426_v0 }
 0x1f5   :  { %2193 = vmatpush3.bf16.msra.mxu1 %v2653_v58 }
 0x1f6   :  { %2194 = vmatprep.subr.bf16.mxu1 %v2426_v0 }
 0x1f9   :  { %2196 = vmatpush3.bf16.msra.mxu1 %v2658_v6 }
 0x1fa   :  { %2197 = vmatprep.subr.bf16.mxu1 %v2426_v0 }
 0x1fd   :  { %2199 = vmatpush3.bf16.msra.mxu1 %v2662_v25 }
 0x1fe   :  { %2200 = vmatprep.subr.bf16.mxu1 %v2426_v0 }
 0x200   :  { %1866 = vmatmul.mubr.f32.vlgmr.msra.gmra.mrb[0].mxu1 %v2781_v62 }
 0x201   :  { %2202 = vmatpush3.bf16.msra.mxu1 %v2668_v26  ;;  %1900 = vmatprep.mubr.msk.f32.mxu1 %vm2427_vm0, %v2428_v1 }
 0x202   :  { %2203 = vmatprep.subr.bf16.mxu1 %v2426_v0 }
 0x205   :  { %2205 = vmatpush3.bf16.msra.mxu1 %v2675_v10 }
 0x206   :  { %2206 = vmatprep.subr.bf16.mxu1 %v2426_v0 }
 0x209   :  { %2208 = vmatpush3.bf16.msra.mxu1 %v2683_v34 }
 0x20a   :  { %2209 = vmatprep.subr.bf16.mxu1 %v2426_v0 }
 0x20d   :  { %2211 = vmatpush3.bf16.msra.mxu1 %v2689_v35 }
 0x20e   :  { %2212 = vmatprep.subr.bf16.mxu1 %v2426_v0 }
 0x211   :  { %2214 = vmatpush3.bf16.msra.mxu1 %v2695_v43 }
 0x212   :  { %2215 = vmatprep.subr.bf16.mxu1 %v2426_v0 }
 0x215   :  { %2217 = vmatpush3.bf16.msra.mxu1 %v2701_v47 }
 0x216   :  { %2218 = vmatprep.subr.bf16.mxu1 %v2426_v0 }
 0x219   :  { %2220 = vmatpush3.bf16.msra.mxu1 %v2707_v48 }
 0x21a   :  { %2221 = vmatprep.subr.bf16.mxu1 %v2426_v0 }
 0x21d   :  { %2223 = vmatpush3.bf16.msra.mxu1 %v2713_v54 }
 0x21e   :  { %2224 = vmatprep.subr.bf16.mxu1 %v2426_v0 }
 0x220   :  { %1901 = vmatmul.mubr.f32.vlgmr.msra.gmra.mrb[0].mxu1 %v795_v63 }
 0x221   :  { %2226 = vmatpush3.bf16.msra.mxu1 %v2492_v12  ;;  %1935 = vmatprep.mubr.msk.f32.mxu1 %vm2427_vm0, %v2428_v1 }
 0x222   :  { %2227 = vmatprep.subr.bf16.mxu1 %v2426_v0 }
 0x225   :  { %2229 = vmatpush3.bf16.msra.mxu1 %v2495_v13 }
 0x226   :  { %2230 = vmatprep.subr.bf16.mxu1 %v2426_v0 }
 0x229   :  { %2232 = vmatpush3.bf16.msra.mxu1 %v2501_v18 }
 0x22a   :  { %2233 = vmatprep.subr.bf16.mxu1 %v2426_v0 }
 0x22d   :  { %2235 = vmatpush3.bf16.msra.mxu1 %v2512_v32 }
 0x22e   :  { %2236 = vmatprep.subr.bf16.mxu1 %v2426_v0 }
 0x231   :  { %2238 = vmatpush3.bf16.msra.mxu1 %v2528_v44 }
 0x232   :  { %2239 = vmatprep.subr.bf16.mxu1 %v2426_v0 }
 0x235   :  { %2241 = vmatpush3.bf16.msra.mxu1 %v2539_v49 }
 0x236   :  { %2242 = vmatprep.subr.bf16.mxu1 %v2426_v0 }
 0x239   :  { %2244 = vmatpush3.bf16.msra.mxu1 %v2541_v50 }
 0x23a   :  { %2245 = vmatprep.subr.bf16.mxu1 %v2426_v0 }
 0x23d   :  { %2247 = vmatpush3.bf16.msra.mxu1 %v2543_v51 }
 0x23e   :  { %2248 = vmatprep.subr.bf16.mxu1 %v2426_v0 }
 0x240   :  { %1936 = vmatmul.mubr.f32.vlgmr.msra.gmra.mrb[0].mxu1 %v796_v2 }
 0x241   :  { %2250 = vmatpush3.bf16.msra.mxu1 %v2597_v27  ;;  %1970 = vmatprep.mubr.msk.f32.mxu1 %vm2427_vm0, %v2428_v1 }
 0x242   :  { %2251 = vmatprep.subr.bf16.mxu1 %v2426_v0 }
 0x245   :  { %2253 = vmatpush3.bf16.msra.mxu1 %v2599_v28 }
 0x246   :  { %2254 = vmatprep.subr.bf16.mxu1 %v2426_v0 }
 0x249   :  { %2256 = vmatpush3.bf16.msra.mxu1 %v2601_v29 }
 0x24a   :  { %2257 = vmatprep.subr.bf16.mxu1 %v2426_v0 }
 0x24d   :  { %2259 = vmatpush3.bf16.msra.mxu1 %v2604_v30 }
 0x24e   :  { %2260 = vmatprep.subr.bf16.mxu1 %v2426_v0 }
 0x251   :  { %2262 = vmatpush3.bf16.msra.mxu1 %v2606_v33 }
 0x252   :  { %2263 = vmatprep.subr.bf16.mxu1 %v2426_v0 }
 0x255   :  { %2265 = vmatpush3.bf16.msra.mxu1 %v2608_v36 }
 0x256   :  { %2266 = vmatprep.subr.bf16.mxu1 %v2426_v0 }
 0x259   :  { %2268 = vmatpush3.bf16.msra.mxu1 %v2610_v37 }
 0x25a   :  { %2269 = vmatprep.subr.bf16.mxu1 %v2426_v0 }
 0x25d   :  { %2271 = vmatpush3.bf16.msra.mxu1 %v2613_v38 }
 0x25e   :  { %2272 = vmatprep.subr.bf16.mxu1 %v2426_v0 }
 0x260   :  { %1971 = vmatmul.mubr.f32.vlgmr.msra.gmra.mrb[0].mxu1 %v2781_v62 }
 0x261   :  { %2274 = vmatpush3.bf16.msra.mxu1 %v2492_v12  ;;  %2005 = vmatprep.mubr.msk.f32.mxu1 %vm2427_vm0, %v2428_v1 }
 0x262   :  { %2275 = vmatprep.subr.bf16.mxu1 %v2426_v0 }
 0x265   :  { %2277 = vmatpush3.bf16.msra.mxu1 %v2495_v13 }
 0x266   :  { %2278 = vmatprep.subr.bf16.mxu1 %v2426_v0 }
 0x269   :  { %2280 = vmatpush3.bf16.msra.mxu1 %v2501_v18 }
 0x26a   :  { %2281 = vmatprep.subr.bf16.mxu1 %v2426_v0 }
 0x26d   :  { %2283 = vmatpush3.bf16.msra.mxu1 %v2512_v32 }
 0x26e   :  { %2284 = vmatprep.subr.bf16.mxu1 %v2426_v0 }
 0x271   :  { %2286 = vmatpush3.bf16.msra.mxu1 %v2528_v44 }
 0x272   :  { %2287 = vmatprep.subr.bf16.mxu1 %v2426_v0 }
 0x275   :  { %2289 = vmatpush3.bf16.msra.mxu1 %v2539_v49 }
 0x276   :  { %2290 = vmatprep.subr.bf16.mxu1 %v2426_v0 }
 0x279   :  { %2292 = vmatpush3.bf16.msra.mxu1 %v2541_v50 }
 0x27a   :  { %2293 = vmatprep.subr.bf16.mxu1 %v2426_v0 }
 0x27d   :  { %2295 = vmatpush3.bf16.msra.mxu1 %v2543_v51 }
 0x280   :  { %2006 = vmatmul.mubr.f32.vlgmr.msra.gmra.mrb[0].mxu1 %v2781_v62 }
 0x353   :  { %v1350_v1 = vpop.f32.mrb[0].mxu1 }
 0x354   :  { %v1354_v12 = vmul.f32 0.03125, %v1350_v1  ;;  %v2007_v13 = vpop.f32.mrb[1].mxu1 }
 0x356   :  { %v1355_v18 = vadd.f32 1e-05, %v1354_v12 }
 0x358   :  { %2325 = vrsqrt.f32 %v1355_v18 }
 0x362   :  { %v2326_v22 = vpop.eup %2325 }
 0x363   :  { %v1357_v32 = vmul.f32 %v2326_v22, %v2777_v59 }
 0x365   :  { %v1365_v44 = vmul.f32 %v1383_v31, %v1357_v32 }
 0x367   :  { %1366 = vst [vmem:[#allocation8] sm:$0xf] %v1365_v44 }
 0x368   :  { %2404 = shalt.err (!%p2401_p0)
}
 0x369   :  { %s2405_s26 = scalar_lea.hbm %s2892_s3, 64 }
 0x36a   :  { %p2406_p1 = scmp.ne.s32.totalorder %s2892_s3, %s2405_s26  ;;  %p2409_p2 = scmp.lt.u32.totalorder %s2405_s26, %s2892_s3 }
 0x36c   :  { %p2411_p3 = pnand %p2409_p2, %p2406_p1 }
 0x36e   :  { %2414 = shalt.err (!%p2411_p3)
}
 0x36f   :  { %1376 = dma.vmem_to_hbm [thread:$0]  %s1374_s22, 64, %s2892_s3, [#allocation4]  }
 0x370   :  { %2419 = dma.done.wait [#allocation4], 64  }
 0x371   :  { %2420 = vsyncadd [#allocation4], 4294967232 }
 0x372   :  { %1380 = vsyncpa [#allocation3], 1 }
 0x373   :  { %1381 = vsyncpa [#allocation6], 1 }
 0x374   :  { %1382 = vsyncpa [#allocation4], 1 }

</bundles_post_ra>
